<compile_context>
chip_gen: v5e
topology: v5e:2x2
jax: 0.10.0
libtpu: 0.0.40
codegen_flags: <defaults>
</compile_context>

<pallas_src>
import functools

import jax
import jax.numpy as jnp
from jax.experimental import pallas as pl
from jax.experimental.pallas import tpu as pltpu


def _decoder_kernel(tok_ref, hid_ref, enc_ref, emb_ref,
                    wg0_ref, bg0_ref, wg1_ref, bg1_ref,
                    wv_ref, bv_ref,
                    pred_ref, hidden_out_ref, *, n_layers, hid):
    H = hid
    L = n_layers
    enc = enc_ref[...]              # (B, S, H)
    hid_blh = hid_ref[...]          # (B, L, H)  -- hidden pre-transposed in wrapper
    B = enc.shape[0]

    # ---------------- embedding gather (tokens in SMEM, table in VMEM) ----------
    rows = [emb_ref[pl.ds(tok_ref[b], 1), :] for b in range(B)]    # (1, E) each
    embed = jnp.concatenate(rows, axis=0)                          # (B, E)

    # ---------------- attention over encoder outputs (batched) ------------------
    # scores[b, l, s] = <hidden[l, b, :], enc[b, s, :]>  (softmax over S = lanes)
    scores = jnp.einsum("blh,bsh->bls", hid_blh, enc,
                        preferred_element_type=jnp.float32)        # (B, L, S)
    scores = scores - jnp.max(scores, axis=-1, keepdims=True)
    e = jnp.exp(scores)
    soft = e / jnp.sum(e, axis=-1, keepdims=True)
    ctx = jnp.einsum("bls,bsh->blh", soft, enc,
                     preferred_element_type=jnp.float32)           # (B, L, H)

    # ---------------- multi-layer GRU, one time step ----------------------------
    # One fused matmul per layer: lhs = [x | h_prev], rhs = blockdiag(Wih.T, Whh.T)
    # so columns [:3H] are gi and [3H:] are gh (kept separate for the n-gate).
    w_gru = [wg0_ref[...], wg1_ref[...]]
    b_gru = [bg0_ref[...], bg1_ref[...]]
    x = embed
    for l in range(L):
        h_prev = ctx[:, l, :]                                      # (B, H)
        lhs = jnp.concatenate([x, h_prev], axis=-1)                # (B, in+H)
        g = jnp.dot(lhs, w_gru[l], preferred_element_type=jnp.float32) + b_gru[l]
        gi = g[:, :3 * H]
        gh = g[:, 3 * H:]
        r = jax.nn.sigmoid(gi[:, 0 * H:1 * H] + gh[:, 0 * H:1 * H])
        z = jax.nn.sigmoid(gi[:, 1 * H:2 * H] + gh[:, 1 * H:2 * H])
        n = jnp.tanh(gi[:, 2 * H:3 * H] + r * gh[:, 2 * H:3 * H])
        h_new = (1.0 - z) * n + z * h_prev
        hidden_out_ref[l] = h_new
        x = h_new

    # ---------------- embedding2vocab: 3 bias-only Linears folded to 1 ----------
    # wv_ref is (H, Vpad) (pre-transposed, zero-padded to 128 lanes) -> unmasked store.
    pred_ref[...] = jnp.dot(x, wv_ref[...],
                            preferred_element_type=jnp.float32) + bv_ref[...]


def prepare_params(params, n_layers):
    """One-time host-side prep: transpose, fuse GRU weights, fold vocab head, pad."""
    H = params["w_hh0"].shape[1]
    prep = {"embedding": params["embedding"].astype(jnp.float32)}
    for l in range(n_layers):
        w_ih_t = params[f"w_ih{l}"].T                      # (in, 3H)
        w_hh_t = params[f"w_hh{l}"].T                      # (H, 3H)
        in_dim = w_ih_t.shape[0]
        w = jnp.zeros((in_dim + H, 6 * H), jnp.float32)    # block-diagonal fuse
        w = w.at[:in_dim, :3 * H].set(w_ih_t)
        w = w.at[in_dim:, 3 * H:].set(w_hh_t)
        prep[f"w_gru{l}"] = w
        prep[f"b_gru{l}"] = jnp.concatenate(
            [params[f"b_ih{l}"], params[f"b_hh{l}"]], axis=1)      # (1, 6H)
    # Fold Linear->Linear->Linear (no nonlinearity between them) into one matmul.
    w1t, w2t, w3t = params["w1"].T, params["w2"].T, params["w3"].T
    w_vocab = w1t @ w2t @ w3t                                      # (H, V)
    b_vocab = params["b1"] @ w2t @ w3t + params["b2"] @ w3t + params["b3"]
    V = w_vocab.shape[1]
    v_pad = ((V + 127) // 128) * 128                               # lane-dense pred
    prep["w_vocab"] = jnp.pad(w_vocab, ((0, 0), (0, v_pad - V))).astype(jnp.float32)
    prep["b_vocab"] = jnp.pad(b_vocab, ((0, 0), (0, v_pad - V))).astype(jnp.float32)
    return prep


@functools.partial(jax.jit, static_argnames=("vocab",))
def decoder_forward(x_tokens, hidden, encoder_outputs, prep, *, vocab):
    """Pallas implementation of Decoder.forward (is_attn=True, n_layers=2)."""
    L, B, H = hidden.shape
    assert L == 2, "kernel is specialized for n_layers == 2"
    v_pad = prep["w_vocab"].shape[1]

    hid_blh = jnp.transpose(hidden, (1, 0, 2))   # (B, L, H) for batched attention

    inputs = [
        x_tokens.astype(jnp.int32), hid_blh, encoder_outputs, prep["embedding"],
        prep["w_gru0"], prep["b_gru0"], prep["w_gru1"], prep["b_gru1"],
        prep["w_vocab"], prep["b_vocab"],
    ]
    kernel = functools.partial(_decoder_kernel, n_layers=L, hid=H)
    vmem = pl.BlockSpec(memory_space=pltpu.MemorySpace.VMEM)
    smem = pl.BlockSpec(memory_space=pltpu.MemorySpace.SMEM)
    pred_pad, hidden_out = pl.pallas_call(
        kernel,
        out_shape=(jax.ShapeDtypeStruct((B, v_pad), jnp.float32),
                   jax.ShapeDtypeStruct((L, B, H), jnp.float32)),
        in_specs=[smem] + [vmem] * (len(inputs) - 1),
        out_specs=(vmem, vmem),
    )(*inputs)
    return pred_pad[:, :vocab], hidden_out


def reference(x_tokens, hidden, enc, params):
    """Pure-JAX reference mirroring the PyTorch forward (unfused weights)."""
    embed = params["embedding"][x_tokens]                      # (B, E)
    L, B, H = hidden.shape
    hid_bhl = jnp.transpose(hidden, (1, 2, 0))                 # (B, H, L)
    attn = jnp.einsum("bsh,bhl->bsl", enc, hid_bhl)            # (B, S, L)
    soft = jax.nn.softmax(attn, axis=1)
    new_hid = jnp.einsum("bls,bsh->blh", jnp.transpose(soft, (0, 2, 1)), enc)
    hidden = jnp.transpose(new_hid, (1, 0, 2))                 # (L, B, H)
    x = embed
    outs = []
    for l in range(L):
        h = hidden[l]
        gi = x @ params[f"w_ih{l}"].T + params[f"b_ih{l}"][0]
        gh = h @ params[f"w_hh{l}"].T + params[f"b_hh{l}"][0]
        r = jax.nn.sigmoid(gi[:, :H] + gh[:, :H])
        z = jax.nn.sigmoid(gi[:, H:2 * H] + gh[:, H:2 * H])
        n = jnp.tanh(gi[:, 2 * H:] + r * gh[:, 2 * H:])
        h_new = (1.0 - z) * n + z * h
        outs.append(h_new)
        x = h_new
    h1 = x @ params["w1"].T + params["b1"][0]
    h2 = h1 @ params["w2"].T + params["b2"][0]
    pred = h2 @ params["w3"].T + params["b3"][0]
    return pred, jnp.stack(outs, axis=0)


def init_params(key, vocab, embed_dim, hidden_dim, n_layers):
    H = hidden_dim * 2
    kit = iter(jax.random.split(key, 8 + 4 * n_layers))

    def nrm(shape, scale=0.1):
        return (scale * jax.random.normal(next(kit), shape)).astype(jnp.float32)

    params = {"embedding": nrm((vocab, embed_dim), 1.0)}
    for l in range(n_layers):
        in_dim = embed_dim if l == 0 else H
        params[f"w_ih{l}"] = nrm((3 * H, in_dim))
        params[f"w_hh{l}"] = nrm((3 * H, H))
        params[f"b_ih{l}"] = nrm((1, 3 * H))
        params[f"b_hh{l}"] = nrm((1, 3 * H))
    params["w1"] = nrm((2 * H, H));      params["b1"] = nrm((1, 2 * H))
    params["w2"] = nrm((4 * H, 2 * H));  params["b2"] = nrm((1, 4 * H))
    params["w3"] = nrm((vocab, 4 * H));  params["b3"] = nrm((1, vocab))
    return params


if __name__ == "__main__":
    # Decoder(cn_vocab_size=64, embed_dim=16, hidden_dim=16, n_layers=2,
    #         dropout=0.0, is_attn=True)  -> self.hidden_dim = 32
    B, S = 2, 8
    vocab, embed_dim, hidden_dim, n_layers = 64, 16, 16, 2
    H = hidden_dim * 2

    key = jax.random.PRNGKey(0)
    kp, kx, kh, ke = jax.random.split(key, 4)
    params = init_params(kp, vocab, embed_dim, hidden_dim, n_layers)
    x_tokens = jax.random.randint(kx, (B,), 0, vocab)
    hidden = jax.random.normal(kh, (n_layers, B, H), dtype=jnp.float32)
    encoder_outputs = jax.random.normal(ke, (B, S, H), dtype=jnp.float32)

    prep = prepare_params(params, n_layers)   # one-time weight preprocessing
    pred, hidden_out = decoder_forward(x_tokens, hidden, encoder_outputs, prep,
                                       vocab=vocab)
    jax.block_until_ready((pred, hidden_out))

    pred_ref, hidden_ref = reference(x_tokens, hidden, encoder_outputs, params)
    assert pred.shape == (B, vocab) and hidden_out.shape == (n_layers, B, H)
    assert jnp.allclose(pred, pred_ref, atol=1e-4, rtol=1e-4)
    assert jnp.allclose(hidden_out, hidden_ref, atol=1e-4, rtol=1e-4)
    print("KERNEL_OK")
</pallas_src>

<mosaic_0001>
module attributes {stable_mosaic.version = 11 : i64} {
  func.func @_decoder_kernel(%arg0: memref<2xi32, #tpu.memory_space<smem>>, %arg1: memref<2x2x32xf32, #tpu.memory_space<vmem>>, %arg2: memref<2x8x32xf32, #tpu.memory_space<vmem>>, %arg3: memref<64x16xf32, #tpu.memory_space<vmem>>, %arg4: memref<48x192xf32, #tpu.memory_space<vmem>>, %arg5: memref<1x192xf32, #tpu.memory_space<vmem>>, %arg6: memref<64x192xf32, #tpu.memory_space<vmem>>, %arg7: memref<1x192xf32, #tpu.memory_space<vmem>>, %arg8: memref<32x128xf32, #tpu.memory_space<vmem>>, %arg9: memref<1x128xf32, #tpu.memory_space<vmem>>, %arg10: memref<2x128xf32, #tpu.memory_space<vmem>>, %arg11: memref<2x2x32xf32, #tpu.memory_space<vmem>>) attributes {dimension_semantics = [], scalar_prefetch = 0 : i64, scratch_operands = 0 : i64, tpu.core_type = #tpu.core_type<tc>} {
    %c0 = arith.constant 0 : index
    %c0_0 = arith.constant 0 : index
    %c0_1 = arith.constant 0 : index
    %0 = vector.load %arg2[%c0, %c0_0, %c0_1] : memref<2x8x32xf32, #tpu.memory_space<vmem>>, vector<2x8x32xf32>
    %c0_2 = arith.constant 0 : index
    %c0_3 = arith.constant 0 : index
    %c0_4 = arith.constant 0 : index
    %1 = vector.load %arg1[%c0_2, %c0_3, %c0_4] : memref<2x2x32xf32, #tpu.memory_space<vmem>>, vector<2x2x32xf32>
    %c0_5 = arith.constant 0 : index
    %2 = memref.load %arg0[%c0_5] : memref<2xi32, #tpu.memory_space<smem>>
    %3 = arith.index_cast %2 : i32 to index
    %c0_6 = arith.constant 0 : index
    %4 = vector.load %arg3[%3, %c0_6] : memref<64x16xf32, #tpu.memory_space<vmem>>, vector<1x16xf32>
    %c1 = arith.constant 1 : index
    %5 = memref.load %arg0[%c1] : memref<2xi32, #tpu.memory_space<smem>>
    %6 = arith.index_cast %5 : i32 to index
    %c0_7 = arith.constant 0 : index
    %7 = vector.load %arg3[%6, %c0_7] : memref<64x16xf32, #tpu.memory_space<vmem>>, vector<1x16xf32>
    %8 = tpu.concatenate %4, %7 in 0 : vector<1x16xf32>, vector<1x16xf32> -> vector<2x16xf32>
    "tpu.trace_start"() <{level = 10 : i32, message = "blh,bsh->bls"}> : () -> ()
    %cst = arith.constant dense<0.000000e+00> : vector<2x2x8xf32>
    %9 = tpu.matmul %1, %0, %cst {dimension_numbers = #tpu.dot_dimension_numbers<[2], [2], [1], [1], [0, 0, 0, 1, 1, 1], [0], [0]>} : vector<2x2x32xf32>, vector<2x8x32xf32>, vector<2x2x8xf32> -> vector<2x2x8xf32>
    "tpu.trace_stop"() : () -> ()
    %cst_8 = arith.constant dense<0xFF800000> : vector<2x2xf32>
    %10 = vector.multi_reduction <maximumf>, %9, %cst_8 [2] : vector<2x2x8xf32> to vector<2x2xf32>
    %11 = vector.shape_cast %10 : vector<2x2xf32> to vector<2x2x1xf32>
    %12 = vector.broadcast %11 : vector<2x2x1xf32> to vector<2x2x8xf32>
    %13 = arith.subf %9, %12 : vector<2x2x8xf32>
    %14 = math.exp %13 : vector<2x2x8xf32>
    %cst_9 = arith.constant dense<0.000000e+00> : vector<2x2xf32>
    %15 = vector.multi_reduction <add>, %14, %cst_9 [2] : vector<2x2x8xf32> to vector<2x2xf32>
    %16 = vector.shape_cast %15 : vector<2x2xf32> to vector<2x2x1xf32>
    %17 = vector.broadcast %16 : vector<2x2x1xf32> to vector<2x2x8xf32>
    %18 = arith.divf %14, %17 : vector<2x2x8xf32>
    "tpu.trace_start"() <{level = 10 : i32, message = "bls,bsh->blh"}> : () -> ()
    %cst_10 = arith.constant dense<0.000000e+00> : vector<2x2x32xf32>
    %19 = tpu.matmul %18, %0, %cst_10 {dimension_numbers = #tpu.dot_dimension_numbers<[2], [1], [1], [2], [0, 0, 0, 1, 1, 2], [0], [0]>} : vector<2x2x8xf32>, vector<2x8x32xf32>, vector<2x2x32xf32> -> vector<2x2x32xf32>
    "tpu.trace_stop"() : () -> ()
    %c0_11 = arith.constant 0 : index
    %c0_12 = arith.constant 0 : index
    %20 = vector.load %arg4[%c0_11, %c0_12] : memref<48x192xf32, #tpu.memory_space<vmem>>, vector<48x192xf32>
    %c0_13 = arith.constant 0 : index
    %c0_14 = arith.constant 0 : index
    %21 = vector.load %arg6[%c0_13, %c0_14] : memref<64x192xf32, #tpu.memory_space<vmem>>, vector<64x192xf32>
    %c0_15 = arith.constant 0 : index
    %c0_16 = arith.constant 0 : index
    %22 = vector.load %arg5[%c0_15, %c0_16] : memref<1x192xf32, #tpu.memory_space<vmem>>, vector<1x192xf32>
    %c0_17 = arith.constant 0 : index
    %c0_18 = arith.constant 0 : index
    %23 = vector.load %arg7[%c0_17, %c0_18] : memref<1x192xf32, #tpu.memory_space<vmem>>, vector<1x192xf32>
    %24 = vector.extract_strided_slice %19 {offsets = [0, 0, 0], sizes = [2, 1, 32], strides = [1, 1, 1]} : vector<2x2x32xf32> to vector<2x1x32xf32>
    %25 = vector.shape_cast %24 : vector<2x1x32xf32> to vector<2x32xf32>
    %26 = tpu.concatenate %8, %25 in 1 : vector<2x16xf32>, vector<2x32xf32> -> vector<2x48xf32>
    %cst_19 = arith.constant dense<0.000000e+00> : vector<2x192xf32>
    %27 = tpu.matmul %26, %20, %cst_19 {dimension_numbers = #tpu.dot_dimension_numbers<[1], [0], [0], [1], [0, 0, 1, 1], [], []>} : vector<2x48xf32>, vector<48x192xf32>, vector<2x192xf32> -> vector<2x192xf32>
    %28 = vector.broadcast %22 : vector<1x192xf32> to vector<2x192xf32>
    %29 = arith.addf %27, %28 : vector<2x192xf32>
    %30 = vector.extract_strided_slice %29 {offsets = [0, 0], sizes = [2, 96], strides = [1, 1]} : vector<2x192xf32> to vector<2x96xf32>
    %31 = vector.extract_strided_slice %29 {offsets = [0, 96], sizes = [2, 96], strides = [1, 1]} : vector<2x192xf32> to vector<2x96xf32>
    %32 = vector.extract_strided_slice %30 {offsets = [0, 0], sizes = [2, 32], strides = [1, 1]} : vector<2x96xf32> to vector<2x32xf32>
    %33 = vector.extract_strided_slice %31 {offsets = [0, 0], sizes = [2, 32], strides = [1, 1]} : vector<2x96xf32> to vector<2x32xf32>
    %34 = arith.addf %32, %33 : vector<2x32xf32>
    %35 = arith.negf %34 : vector<2x32xf32>
    %36 = math.exp %35 : vector<2x32xf32>
    %cst_20 = arith.constant 1.000000e+00 : f32
    %37 = vector.broadcast %cst_20 : f32 to vector<2x32xf32>
    %38 = arith.addf %37, %36 : vector<2x32xf32>
    %39 = arith.divf %37, %38 : vector<2x32xf32>
    %40 = vector.extract_strided_slice %30 {offsets = [0, 32], sizes = [2, 32], strides = [1, 1]} : vector<2x96xf32> to vector<2x32xf32>
    %41 = vector.extract_strided_slice %31 {offsets = [0, 32], sizes = [2, 32], strides = [1, 1]} : vector<2x96xf32> to vector<2x32xf32>
    %42 = arith.addf %40, %41 : vector<2x32xf32>
    %43 = arith.negf %42 : vector<2x32xf32>
    %44 = math.exp %43 : vector<2x32xf32>
    %cst_21 = arith.constant 1.000000e+00 : f32
    %45 = vector.broadcast %cst_21 : f32 to vector<2x32xf32>
    %46 = arith.addf %45, %44 : vector<2x32xf32>
    %47 = arith.divf %45, %46 : vector<2x32xf32>
    %48 = vector.extract_strided_slice %30 {offsets = [0, 64], sizes = [2, 32], strides = [1, 1]} : vector<2x96xf32> to vector<2x32xf32>
    %49 = vector.extract_strided_slice %31 {offsets = [0, 64], sizes = [2, 32], strides = [1, 1]} : vector<2x96xf32> to vector<2x32xf32>
    %50 = arith.mulf %39, %49 : vector<2x32xf32>
    %51 = arith.addf %48, %50 : vector<2x32xf32>
    %52 = math.tanh %51 : vector<2x32xf32>
    %cst_22 = arith.constant 1.000000e+00 : f32
    %53 = vector.broadcast %cst_22 : f32 to vector<2x32xf32>
    %54 = arith.subf %53, %47 : vector<2x32xf32>
    %55 = arith.mulf %54, %52 : vector<2x32xf32>
    %56 = arith.mulf %47, %25 : vector<2x32xf32>
    %57 = arith.addf %55, %56 : vector<2x32xf32>
    %c0_23 = arith.constant 0 : index
    %c0_24 = arith.constant 0 : index
    %c0_25 = arith.constant 0 : index
    %58 = vector.load %arg11[%c0_23, %c0_24, %c0_25] : memref<2x2x32xf32, #tpu.memory_space<vmem>>, vector<1x2x32xf32>
    %59 = vector.shape_cast %58 : vector<1x2x32xf32> to vector<2x32xf32>
    %60 = vector.shape_cast %57 : vector<2x32xf32> to vector<1x2x32xf32>
    tpu.vector_store %arg11[%c0_23, %c0_24, %c0_25], %60 {strides = array<i32>} : memref<2x2x32xf32, #tpu.memory_space<vmem>>, vector<1x2x32xf32>,
    %61 = vector.extract_strided_slice %19 {offsets = [0, 1, 0], sizes = [2, 1, 32], strides = [1, 1, 1]} : vector<2x2x32xf32> to vector<2x1x32xf32>
    %62 = vector.shape_cast %61 : vector<2x1x32xf32> to vector<2x32xf32>
    %63 = tpu.concatenate %57, %62 in 1 : vector<2x32xf32>, vector<2x32xf32> -> vector<2x64xf32>
    %cst_26 = arith.constant dense<0.000000e+00> : vector<2x192xf32>
    %64 = tpu.matmul %63, %21, %cst_26 {dimension_numbers = #tpu.dot_dimension_numbers<[1], [0], [0], [1], [0, 0, 1, 1], [], []>} : vector<2x64xf32>, vector<64x192xf32>, vector<2x192xf32> -> vector<2x192xf32>
    %65 = vector.broadcast %23 : vector<1x192xf32> to vector<2x192xf32>
    %66 = arith.addf %64, %65 : vector<2x192xf32>
    %67 = vector.extract_strided_slice %66 {offsets = [0, 0], sizes = [2, 96], strides = [1, 1]} : vector<2x192xf32> to vector<2x96xf32>
    %68 = vector.extract_strided_slice %66 {offsets = [0, 96], sizes = [2, 96], strides = [1, 1]} : vector<2x192xf32> to vector<2x96xf32>
    %69 = vector.extract_strided_slice %67 {offsets = [0, 0], sizes = [2, 32], strides = [1, 1]} : vector<2x96xf32> to vector<2x32xf32>
    %70 = vector.extract_strided_slice %68 {offsets = [0, 0], sizes = [2, 32], strides = [1, 1]} : vector<2x96xf32> to vector<2x32xf32>
    %71 = arith.addf %69, %70 : vector<2x32xf32>
    %72 = arith.negf %71 : vector<2x32xf32>
    %73 = math.exp %72 : vector<2x32xf32>
    %cst_27 = arith.constant 1.000000e+00 : f32
    %74 = vector.broadcast %cst_27 : f32 to vector<2x32xf32>
    %75 = arith.addf %74, %73 : vector<2x32xf32>
    %76 = arith.divf %74, %75 : vector<2x32xf32>
    %77 = vector.extract_strided_slice %67 {offsets = [0, 32], sizes = [2, 32], strides = [1, 1]} : vector<2x96xf32> to vector<2x32xf32>
    %78 = vector.extract_strided_slice %68 {offsets = [0, 32], sizes = [2, 32], strides = [1, 1]} : vector<2x96xf32> to vector<2x32xf32>
    %79 = arith.addf %77, %78 : vector<2x32xf32>
    %80 = arith.negf %79 : vector<2x32xf32>
    %81 = math.exp %80 : vector<2x32xf32>
    %cst_28 = arith.constant 1.000000e+00 : f32
    %82 = vector.broadcast %cst_28 : f32 to vector<2x32xf32>
    %83 = arith.addf %82, %81 : vector<2x32xf32>
    %84 = arith.divf %82, %83 : vector<2x32xf32>
    %85 = vector.extract_strided_slice %67 {offsets = [0, 64], sizes = [2, 32], strides = [1, 1]} : vector<2x96xf32> to vector<2x32xf32>
    %86 = vector.extract_strided_slice %68 {offsets = [0, 64], sizes = [2, 32], strides = [1, 1]} : vector<2x96xf32> to vector<2x32xf32>
    %87 = arith.mulf %76, %86 : vector<2x32xf32>
    %88 = arith.addf %85, %87 : vector<2x32xf32>
    %89 = math.tanh %88 : vector<2x32xf32>
    %cst_29 = arith.constant 1.000000e+00 : f32
    %90 = vector.broadcast %cst_29 : f32 to vector<2x32xf32>
    %91 = arith.subf %90, %84 : vector<2x32xf32>
    %92 = arith.mulf %91, %89 : vector<2x32xf32>
    %93 = arith.mulf %84, %62 : vector<2x32xf32>
    %94 = arith.addf %92, %93 : vector<2x32xf32>
    %c1_30 = arith.constant 1 : index
    %c0_31 = arith.constant 0 : index
    %c0_32 = arith.constant 0 : index
    %95 = vector.load %arg11[%c1_30, %c0_31, %c0_32] : memref<2x2x32xf32, #tpu.memory_space<vmem>>, vector<1x2x32xf32>
    %96 = vector.shape_cast %95 : vector<1x2x32xf32> to vector<2x32xf32>
    %97 = vector.shape_cast %94 : vector<2x32xf32> to vector<1x2x32xf32>
    tpu.vector_store %arg11[%c1_30, %c0_31, %c0_32], %97 {strides = array<i32>} : memref<2x2x32xf32, #tpu.memory_space<vmem>>, vector<1x2x32xf32>,
    %c0_33 = arith.constant 0 : index
    %c0_34 = arith.constant 0 : index
    %98 = vector.load %arg8[%c0_33, %c0_34] : memref<32x128xf32, #tpu.memory_space<vmem>>, vector<32x128xf32>
    %cst_35 = arith.constant dense<0.000000e+00> : vector<2x128xf32>
    %99 = tpu.matmul %94, %98, %cst_35 {dimension_numbers = #tpu.dot_dimension_numbers<[1], [0], [0], [1], [0, 0, 1, 1], [], []>} : vector<2x32xf32>, vector<32x128xf32>, vector<2x128xf32> -> vector<2x128xf32>
    %c0_36 = arith.constant 0 : index
    %c0_37 = arith.constant 0 : index
    %100 = vector.load %arg9[%c0_36, %c0_37] : memref<1x128xf32, #tpu.memory_space<vmem>>, vector<1x128xf32>
    %101 = vector.broadcast %100 : vector<1x128xf32> to vector<2x128xf32>
    %102 = arith.addf %99, %101 : vector<2x128xf32>
    %c0_38 = arith.constant 0 : index
    %c0_39 = arith.constant 0 : index
    %103 = vector.load %arg10[%c0_38, %c0_39] : memref<2x128xf32, #tpu.memory_space<vmem>>, vector<2x128xf32>
    tpu.vector_store %arg10[%c0_38, %c0_39], %102 {strides = array<i32>} : memref<2x128xf32, #tpu.memory_space<vmem>>, vector<2x128xf32>,
    return
  }
}

</mosaic_0001>

<bundles_post_ra>
// kernel: decoder_forward.1
= control target key start
LH: loop header
LB: loop body
LE: loop exit
PB: predicated region body
PF: predicated region fallthrough
CT: control target
= control target key end

     0   :  { %17 = vsyncpa [#allocation5], 0  ;;  %s955_s0 = inlined_call_operand.vmem [shape: s32[2], index: 0, kind: input, shape index: {}]   ;;  %s956_s1 = inlined_call_operand.vmem [shape: f32[2,2,32], index: 1, kind: input, shape index: {}]   ;;  %s957_s2 = inlined_call_operand.vmem [shape: f32[2,8,32], index: 2, kind: input, shape index: {}]   ;;  %s958_s3 = inlined_call_operand.vmem [shape: f32[64,16], index: 3, kind: input, shape index: {}]   ;;  %s959_s4 = inlined_call_operand.hbm [shape: f32[48,192], index: 4, kind: input, shape index: {}]   ;;  %s960_s5 = inlined_call_operand.vmem [shape: f32[1,192], index: 5, kind: input, shape index: {}]   ;;  %s961_s6 = inlined_call_operand.hbm [shape: f32[64,192], index: 6, kind: input, shape index: {}]   ;;  %s962_s7 = inlined_call_operand.vmem [shape: f32[1,192], index: 7, kind: input, shape index: {}]   ;;  %s963_s8 = inlined_call_operand.vmem [shape: f32[32,128], index: 8, kind: input, shape index: {}]   ;;  %s964_s9 = inlined_call_operand.vmem [shape: f32[1,128], index: 9, kind: input, shape index: {}]   ;;  %s965_s10 = inlined_call_operand.hbm [shape: f32[2,128], index: 10, kind: output, shape index: {0}]   ;;  %s966_s11 = inlined_call_operand.hbm [shape: f32[2,2,32], index: 11, kind: output, shape index: {1}]  }
   0x1   :  { %18 = vsyncpa [#allocation3], 0 }
   0x2   :  { %19 = vsyncpa [#allocation8], 0 }
   0x3   :  { %20 = vsyncpa [#allocation4], 0 }
   0x4   :  { %21 = vsyncpa [#allocation11], 0  ;;  %s27_s19 = sshll.u32 %s955_s0, 4  ;;  %s41_s22 = sshll.u32 %s959_s4, 4  ;;  %s28_s19 = int_to_ptr.vmem [resolvable:$true] %s27_s19  ;;  %s42_s22 = int_to_ptr.hbm [resolvable:$true] %s41_s22 }
   0x5   :  { %s783_s23 = smov [#allocation2]   ;;  %s784_s24 = smov [#allocation6]  }
   0x6   :  { %30 = dma.vmem_to_smem %s28_s19, 16, %s783_s23, [#allocation5]  }
   0x7   :  { %s43_s25 = sshll.u32 %s784_s24, 4  ;;  %s785_s26 = smov 256   ;;  %s44_s25 = int_to_ptr.vmem [resolvable:$true] %s43_s25 }
   0x8   :  { %s786_s27 = smov 16   ;;  %s56_s30 = sshll.u32 %s961_s6, 4  ;;  %s57_s30 = int_to_ptr.hbm [resolvable:$true] %s56_s30 }
   0x9   :  { %49 = dma.hbm_to_vmem [thread:$0]  %s42_s22, 1536, %s44_s25, [#allocation3], %s785_s26, %s785_s26, %s786_s27  }
   0xa   :  { %s787_s0 = smov [#allocation7]  }
   0xb   :  { %s58_s12 = sshll.u32 %s787_s0, 4  ;;  %s59_s12 = int_to_ptr.vmem [resolvable:$true] %s58_s12 }
   0xc   :  { %64 = dma.hbm_to_vmem [thread:$0]  %s57_s30, 2048, %s59_s12, [#allocation8], %s785_s26, %s785_s26, %s786_s27  }
   0xd   :  { %773 = dma.done.wait [#allocation5], 16  }
   0xe   :  { %774 = vsyncadd [#allocation5], 4294967280 }
   0xf   :  { %775 = dma.done.wait [#allocation3], 1536  }
  0x10   :  { %776 = vsyncadd [#allocation3], 4294965760 }
  0x11   :  { %777 = dma.done.wait [#allocation8], 2048  }
  0x12   :  { %778 = vsyncadd [#allocation8], 4294965248 }
  0x13   :  { %83 = sfence }
  0x14   :  { %v85_v0 = vld [vmem:[%s957_s2 + $0x8] sm:$0xff]  ;;  %vm99_vm0 = vcmask 261120   ;;  %v84_v1 = vld [vmem:[%s957_s2] sm:$0xff]  ;;  %vm152_vm1 = vcmask 58368   ;;  %vm201_vm6 = vcmask 64512   ;;  %v258_v42 = vld [vmem:[#allocation6 + $0x50] sm:$0xff] }
  0x15   :  { %612 = vmatpush.xpose.msk.msra.mxu1 %vm99_vm0, %v85_v0  ;;  %v87_v2 = vld [vmem:[%s956_s1 + $0x2] sm:$0x3]  ;;  %610 = vmatpush.xpose.msk.msra.mxu0 %vm99_vm0, %v84_v1  ;;  %v86_v3 = vld [vmem:[%s956_s1] sm:$0x3]  ;;  %v259_v43 = vld [vmem:[#allocation6 + $0x58] sm:$0xff]  ;;  %vm281_vm11 = vcmask 1041409  }
  0x16   :  { %243 = vmatpush.msra.mxu3 %v85_v0  ;;  %220 = vmatpush.msra.mxu2 %v84_v1  ;;  %v256_v44 = vld [vmem:[#allocation6 + $0x40] sm:$0xff]  ;;  %v257_v45 = vld [vmem:[#allocation6 + $0x48] sm:$0xff]  ;;  %v254_v46 = vld [vmem:[#allocation6 + $0x30] sm:$0xff]  ;;  %s609_s1 = sld [smem:[#allocation2 + $0x1]]  ;;  %vm97_vm12 = vcmask 1040384   ;;  %vm286_vm13 = vcmask 130048  }
  0x17   :  { %v255_v47 = vld [vmem:[#allocation6 + $0x38] sm:$0xff]  ;;  %v252_v48 = vld [vmem:[#allocation6 + $0x20] sm:$0xff]  ;;  %v253_v49 = vld [vmem:[#allocation6 + $0x28] sm:$0xff]  ;;  %s88_s2 = sld [smem:[#allocation2]]  ;;  %vm293_vm14 = vcmask 392192   ;;  %s587_s18 = sshll.u32 %s966_s11, 4  ;;  %s588_s18 = int_to_ptr.hbm [resolvable:$true] %s587_s18 }
  0x18   :  { %613 = vmatmul.msk.f32.vlgmr.msra.gmra.mxu1 %vm99_vm0, %v87_v2  ;;  %611 = vmatmul.msk.f32.vlgmr.msra.gmra.mxu0 %vm99_vm0, %v86_v3  ;;  %v250_v50 = vld [vmem:[#allocation6 + $0x10] sm:$0xff]  ;;  %v251_v51 = vld [vmem:[#allocation6 + $0x18] sm:$0xff]  ;;  %v248_v56 = vld [vmem:[#allocation6] sm:$0xff]  ;;  %s793_s20 = smov [#allocation9]  }
  0x19   :  { %307 = vmatpush.msrb.mxu2 %v258_v42  ;;  %327 = vmatpush.msrb.mxu3 %v259_v43  ;;  %v249_v57 = vld [vmem:[#allocation6 + $0x8] sm:$0xff]  ;;  %v276_v0 = vld [vmem:[%s960_s5] sm:$0x3]  ;;  %s790_s5 = smov 64  }
  0x1a   :  { %v289_v1 = vperm.slane %v276_v0, 0  ;;  %v290_v2 = vperm.slane %v276_v0, 1  ;;  %v268_v42 = vld [vmem:[#allocation7 + $0x40] sm:$0xff]  ;;  %v269_v43 = vld [vmem:[#allocation7 + $0x48] sm:$0xff] }
  0x1b   :  { %308 = vmatpush.msrb.mxu2 %v256_v44  ;;  %328 = vmatpush.msrb.mxu3 %v257_v45  ;;  %v266_v45 = vld [vmem:[#allocation7 + $0x30] sm:$0xff]  ;;  %v260_v0 = vld [vmem:[#allocation7] sm:$0xff] }
  0x1c   :  { %s92_s21 = scalar_lea.vmem %s958_s3, %s609_s1  ;;  %s792_s1 = smov 2  }
  0x1d   :  { %309 = vmatpush.msrb.mxu2 %v254_v46  ;;  %329 = vmatpush.msrb.mxu3 %v255_v47  ;;  %v93_v58 = vld [vmem:[%s92_s21] sm:$0x1]  ;;  %s89_s24 = scalar_lea.vmem %s958_s3, %s88_s2  ;;  %s788_s3 = smov 96   ;;  %v267_v46 = vld [vmem:[#allocation7 + $0x38] sm:$0xff] }
  0x1e   :  { %v95_v59 = vrot.slane %v93_v58, 7  ;;  %v90_v60 = vld [vmem:[%s89_s24] sm:$0x1]  ;;  %s575_s21 = sshll.u32 %s793_s20, 4  ;;  %s577_s24 = sshll.u32 %s965_s10, 4  ;;  %s576_s21 = int_to_ptr.vmem [resolvable:$true] %s575_s21  ;;  %s578_s24 = int_to_ptr.hbm [resolvable:$true] %s577_s24 }
  0x1f   :  { %310 = vmatpush.msrb.mxu2 %v252_v48  ;;  %330 = vmatpush.msrb.mxu3 %v253_v49  ;;  %v264_v47 = vld [vmem:[#allocation7 + $0x20] sm:$0xff]  ;;  %v265_v48 = vld [vmem:[#allocation7 + $0x28] sm:$0xff] }
  0x20   :  { %v98_v61 = vsel %vm97_vm12, %v90_v60, %v95_v59 }
  0x21   :  { %311 = vmatpush.msrb.mxu2 %v250_v50  ;;  %331 = vmatpush.msrb.mxu3 %v251_v51  ;;  %v262_v50 = vld [vmem:[#allocation7 + $0x10] sm:$0xff]  ;;  %v263_v51 = vld [vmem:[#allocation7 + $0x18] sm:$0xff] }
  0x23   :  { %312 = vmatpush.msrb.mxu2 %v248_v56  ;;  %332 = vmatpush.msrb.mxu3 %v249_v57 }
  0x95   :  { %v149_v4 = vpop.f32.mrf.mxu1  ;;  %v123_v6 = vpop.f32.mrf.mxu0 }
  0x96   :  { %v156_v5 = vsel %vm152_vm1, %v149_v4, -inf  ;;  %v153_v7 = vsel %vm152_vm1, %v123_v6, -inf }
  0x97   :  { %157 = vmax.xlane.f32.xlu0 %v156_v5 }
  0x9f   :  { %154 = vmax.xlane.f32.xlu0 %v153_v7 }
 0x10a   :  { %v158_v8 = vpop.xlane.xlu0 %157 }
 0x10b   :  { %v160_v9 = vsub.f32 %v149_v4, %v158_v8 }
 0x10d   :  { %v163_v10 = vmul.f32 1.442695, %v160_v9 }
 0x10f   :  { %637 = vpow2.f32 %v163_v10 }
 0x112   :  { %v155_v11 = vpop.xlane.xlu0 %154 }
 0x113   :  { %v159_v12 = vsub.f32 %v123_v6, %v155_v11 }
 0x115   :  { %v638_v13 = vpop.eup %637  ;;  %v161_v14 = vmul.f32 1.442695, %v159_v12 }
 0x116   :  { %v168_v15 = vsel %vm152_vm1, %v638_v13, 0.0 }
 0x117   :  { %639 = vpow2.f32 %v161_v14  ;;  %169 = vadd.xlane.f32.xlu1 %v168_v15 }
 0x11d   :  { %v640_v16 = vpop.eup %639 }
 0x11e   :  { %v165_v17 = vsel %vm152_vm1, %v640_v16, 0.0 }
 0x11f   :  { %166 = vadd.xlane.f32.xlu1 %v165_v17 }
 0x18a   :  { %v170_v18 = vpop.xlane.xlu1 %169 }
 0x18b   :  { %641 = vrcp.f32 %v170_v18  ;;  %v197_v23 = vand.u32 2147483648, %v170_v18  ;;  %v195_v25 = vand.u32 2147483647, %v170_v18  ;;  %vm191_vm3 = vweird.f32 %v170_v18 }
 0x18d   :  { %v198_v28 = vor.u32 1.1754944e-38, %v197_v23  ;;  %vm196_vm5 = vcmp.eq.f32.partialorder %v195_v25, 8.507059e+37 }
 0x191   :  { %v642_v19 = vpop.eup %641 }
 0x192   :  { %v187_v20 = vmul.f32 %v642_v19, %v170_v18  ;;  %v167_v21 = vpop.xlane.xlu1 %166  ;;  %vm192_vm2 = vweird.f32 %v642_v19 }
 0x193   :  { %643 = vrcp.f32 %v167_v21  ;;  %vm193_vm4 = vmor %vm191_vm3, %vm192_vm2  ;;  %v182_v34 = vand.u32 2147483648, %v167_v21  ;;  %v180_v36 = vand.u32 2147483647, %v167_v21  ;;  %vm176_vm8 = vweird.f32 %v167_v21 }
 0x194   :  { %v188_v22 = vsub.f32 1.0, %v187_v20 }
 0x195   :  { %v183_v38 = vor.u32 1.1754944e-38, %v182_v34  ;;  %vm181_vm10 = vcmp.eq.f32.partialorder %v180_v36, 8.507059e+37  ;;  %v275_v36 = vld [vmem:[#allocation7 + $0x78] sm:$0xff] }
 0x196   :  { %v189_v24 = vmul.f32 %v642_v19, %v188_v22  ;;  %455 = vmatpush.msrb.mxu1 %v275_v36 }
 0x198   :  { %v190_v26 = vadd.f32 %v642_v19, %v189_v24 }
 0x199   :  { %v644_v27 = vpop.eup %643 }
 0x19a   :  { %v172_v29 = vmul.f32 %v644_v27, %v167_v21  ;;  %v194_v30 = vsel %vm193_vm4, %v642_v19, %v190_v26  ;;  %vm177_vm7 = vweird.f32 %v644_v27 }
 0x19b   :  { %v199_v31 = vsel %vm196_vm5, %v198_v28, %v194_v30  ;;  %vm178_vm9 = vmor %vm176_vm8, %vm177_vm7  ;;  %vm410_vm8 = vcmask 254976  }
 0x19c   :  { %v173_v32 = vsub.f32 1.0, %v172_v29  ;;  %v200_v33 = vmul.f32 %v638_v13, %v199_v31 }
 0x19e   :  { %v174_v35 = vmul.f32 %v644_v27, %v173_v32  ;;  %615 = vmatmul.msk.f32.vlgmr.msra.gmra.mxu3 %vm201_vm6, %v200_v33 }
 0x1a0   :  { %v175_v37 = vadd.f32 %v644_v27, %v174_v35  ;;  %v274_v35 = vld [vmem:[#allocation7 + $0x70] sm:$0xff] }
 0x1a1   :  { %435 = vmatpush.msrb.mxu0 %v274_v35 }
 0x1a2   :  { %v179_v39 = vsel %vm178_vm9, %v644_v27, %v175_v37  ;;  %v272_v37 = vld [vmem:[#allocation7 + $0x60] sm:$0xff]  ;;  %vm423_vm9 = vcmask 523264  }
 0x1a3   :  { %v184_v40 = vsel %vm181_vm10, %v183_v38, %v179_v39  ;;  %v273_v39 = vld [vmem:[#allocation7 + $0x68] sm:$0xff]  ;;  %436 = vmatpush.msrb.mxu0 %v272_v37  ;;  %v542_v37 = vld [vmem:[%s963_s8 + $0x18] sm:$0xff] }
 0x1a4   :  { %v185_v41 = vmul.f32 %v640_v16, %v184_v40  ;;  %v270_v40 = vld [vmem:[#allocation7 + $0x50] sm:$0xff]  ;;  %456 = vmatpush.msrb.mxu1 %v273_v39 }
 0x1a5   :  { %437 = vmatpush.msrb.mxu0 %v270_v40  ;;  %v540_v40 = vld [vmem:[%s963_s8 + $0x8] sm:$0xff] }
 0x1a6   :  { %614 = vmatmul.msk.f32.vlgmr.msra.gmra.mxu2 %vm201_vm6, %v185_v41  ;;  %v271_v41 = vld [vmem:[#allocation7 + $0x58] sm:$0xff] }
 0x1a7   :  { %457 = vmatpush.msrb.mxu1 %v271_v41  ;;  %438 = vmatpush.msrb.mxu0 %v268_v42  ;;  %v539_v42 = vld [vmem:[%s963_s8] sm:$0xff] }
 0x1a8   :  { %561 = vmatpush.msra.mxu2 %v542_v37 }
 0x1a9   :  { %458 = vmatpush.msrb.mxu1 %v269_v43  ;;  %439 = vmatpush.msrb.mxu0 %v266_v45 }
 0x1ab   :  { %459 = vmatpush.msrb.mxu1 %v267_v46  ;;  %440 = vmatpush.msrb.mxu0 %v264_v47 }
 0x1ad   :  { %460 = vmatpush.msrb.mxu1 %v265_v48  ;;  %441 = vmatpush.msrb.mxu0 %v262_v50 }
 0x1af   :  { %461 = vmatpush.msrb.mxu1 %v263_v51  ;;  %442 = vmatpush.msrb.mxu0 %v260_v0 }
 0x221   :  { %v887_v52 = vpop.f32.mrf.mxu3 }
 0x222   :  { %v280_v53 = vrot.slane %v887_v52, 7 }
 0x229   :  { %v890_v54 = vpop.f32.mrf.mxu2 }
 0x22a   :  { %v282_v55 = vsel %vm281_vm11, %v280_v53, %v890_v54  ;;  %v412_v27 = vrot.slane %v890_v54, 1 }
 0x22b   :  { %283 = vrot.lane.b32.xlu2 %v282_v55, %s786_s27  ;;  %s789_s27 = smov 32  }
 0x22c   :  { %v413_v28 = vsel %vm281_vm11, %v887_v52, %v412_v27 }
 0x285   :  { %v284_v62 = vpop.permute.xlu2 %283 }
 0x286   :  { %v287_v63 = vsel %vm286_vm13, %v98_v61, %v284_v62 }
 0x287   :  { %616 = vmatmul.msk.f32.vlgmr.msrb.gmra.mxu2 %vm293_vm14, %v287_v63  ;;  %617 = vmatmul.msk.f32.vlgmr.msrb.gmra.mxu3 %vm293_vm14, %v287_v63 }
 0x30a   :  { %v314_v3 = vpop.f32.mrf.mxu2  ;;  %v334_v4 = vpop.f32.mrf.mxu3 }
 0x30b   :  { %v315_v5 = vadd.f32 %v314_v3, %v289_v1  ;;  %v335_v6 = vadd.f32 %v334_v4, %v290_v2  ;;  %v261_v1 = vld [vmem:[#allocation7 + $0x8] sm:$0xff] }
 0x30c   :  { %462 = vmatpush.msrb.mxu1 %v261_v1 }
 0x30d   :  { %385 = vrot.lane.b32.xlu0 %v335_v6, %s788_s3  ;;  %338 = vrot.lane.b32.xlu2 %v315_v5, %s789_s27 }
 0x315   :  { %362 = vrot.lane.b32.xlu2 %v335_v6, %s789_s27 }
 0x367   :  { %v339_v7 = vpop.permute.xlu2 %338 }
 0x368   :  { %v341_v8 = vadd.f32 %v339_v7, %v315_v5 }
 0x36a   :  { %v618_v9 = vmul.f32 -1.442695, %v341_v8 }
 0x36c   :  { %645 = vpow2.f32 %v618_v9 }
 0x36f   :  { %v363_v29 = vpop.permute.xlu2 %362 }
 0x370   :  { %v365_v30 = vadd.f32 %v363_v29, %v315_v5 }
 0x372   :  { %v646_v10 = vpop.eup %645  ;;  %v619_v31 = vmul.f32 -1.442695, %v365_v30 }
 0x373   :  { %v345_v11 = vadd.f32 1.0, %v646_v10 }
 0x375   :  { %647 = vrcp.f32 %v345_v11  ;;  %v357_v15 = vand.u32 2147483648, %v345_v11  ;;  %v355_v17 = vand.u32 2147483647, %v345_v11  ;;  %vm351_vm1 = vweird.f32 %v345_v11 }
 0x377   :  { %v358_v19 = vor.u32 1.1754944e-38, %v357_v15  ;;  %vm356_vm3 = vcmp.eq.f32.partialorder %v355_v17, 8.507059e+37 }
 0x37b   :  { %v648_v12 = vpop.eup %647 }
 0x37c   :  { %v347_v13 = vmul.f32 %v648_v12, %v345_v11  ;;  %vm352_vm15 = vweird.f32 %v648_v12 }
 0x37d   :  { %vm353_vm2 = vmor %vm351_vm1, %vm352_vm15 }
 0x37e   :  { %v348_v14 = vsub.f32 1.0, %v347_v13 }
 0x37f   :  { %v386_v21 = vpop.permute.xlu0 %385 }
 0x380   :  { %v349_v16 = vmul.f32 %v648_v12, %v348_v14 }
 0x382   :  { %v350_v18 = vadd.f32 %v648_v12, %v349_v16 }
 0x384   :  { %v354_v20 = vsel %vm353_vm2, %v648_v12, %v350_v18 }
 0x385   :  { %v359_v22 = vsel %vm356_vm3, %v358_v19, %v354_v20 }
 0x386   :  { %v388_v23 = vmul.f32 %v386_v21, %v359_v22 }
 0x388   :  { %390 = vrot.lane.b32.xlu1 %v388_v23, %s790_s5 }
 0x3fa   :  { %v391_v24 = vpop.permute.xlu1 %390 }
 0x3fb   :  { %v393_v25 = vadd.f32 %v391_v24, %v315_v5  ;;  %v277_v5 = vld [vmem:[%s962_s7] sm:$0x3] }
 0x3fc   :  { %v419_v6 = vperm.slane %v277_v5, 0  ;;  %v420_v7 = vperm.slane %v277_v5, 1 }
 0x3fd   :  { %649 = vtanh.f32 %v393_v25 }
 0x3fe   :  { %651 = vpow2.f32 %v619_v31 }
 0x403   :  { %v650_v26 = vpop.eup %649 }
 0x404   :  { %397 = vrot.lane.b32.xlu2 %v650_v26, %s788_s3  ;;  %v652_v32 = vpop.eup %651 }
 0x405   :  { %v369_v33 = vadd.f32 1.0, %v652_v32 }
 0x407   :  { %653 = vrcp.f32 %v369_v33  ;;  %v381_v53 = vand.u32 2147483648, %v369_v33  ;;  %vm375_vm5 = vweird.f32 %v369_v33  ;;  %v379_v54 = vand.u32 2147483647, %v369_v33 }
 0x409   :  { %v382_v57 = vor.u32 1.1754944e-38, %v381_v53  ;;  %vm380_vm7 = vcmp.eq.f32.partialorder %v379_v54, 8.507059e+37 }
 0x40c   :  { %401 = vrot.lane.b32.xlu2 %v282_v55, %s789_s27 }
 0x40d   :  { %v654_v34 = vpop.eup %653 }
 0x40e   :  { %v371_v38 = vmul.f32 %v654_v34, %v369_v33  ;;  %vm376_vm4 = vweird.f32 %v654_v34 }
 0x40f   :  { %vm377_vm6 = vmor %vm375_vm5, %vm376_vm4 }
 0x410   :  { %v372_v44 = vsub.f32 1.0, %v371_v38  ;;  %v541_v38 = vld [vmem:[%s963_s8 + $0x10] sm:$0xff]  ;;  %s791_s8 = smov [#allocation10]  }
 0x411   :  { %562 = vmatpush.msra.mxu2 %v541_v38  ;;  %s585_s15 = sshll.u32 %s791_s8, 4  ;;  %s586_s15 = int_to_ptr.vmem [resolvable:$true] %s585_s15 }
 0x412   :  { %v373_v49 = vmul.f32 %v654_v34, %v372_v44 }
 0x413   :  { %563 = vmatpush.msra.mxu2 %v540_v40 }
 0x414   :  { %414 = vrot.lane.b32.xlu2 %v413_v28, %s789_s27  ;;  %v374_v52 = vadd.f32 %v654_v34, %v373_v49 }
 0x415   :  { %564 = vmatpush.msra.mxu2 %v539_v42 }
 0x416   :  { %v378_v56 = vsel %vm377_vm6, %v654_v34, %v374_v52 }
 0x417   :  { %v383_v58 = vsel %vm380_vm7, %v382_v57, %v378_v56  ;;  %v636_v57 = vld [vmem:[%s964_s9] ss:$0 sm:$0xff] }
 0x418   :  { %v395_v59 = vsub.f32 1.0, %v383_v58 }
 0x45e   :  { %v398_v55 = vpop.permute.xlu2 %397 }
 0x45f   :  { %v400_v61 = vmul.f32 %v398_v55, %v395_v59 }
 0x466   :  { %v402_v60 = vpop.permute.xlu2 %401 }
 0x467   :  { %v404_v62 = vmul.f32 %v402_v60, %v383_v58 }
 0x469   :  { %v405_v63 = vadd.f32 %v404_v62, %v400_v61 }
 0x46b   :  { %407 = vrot.lane.b32.xlu0 %v405_v63, %s788_s3 }
 0x46e   :  { %v915_v2 = vpop.permute.xlu2 %414 }
 0x4dd   :  { %v408_v3 = vpop.permute.xlu0 %407 }
 0x4de   :  { %v417_v4 = vsel %vm99_vm0, %v408_v3, %v915_v2  ;;  %411 = vst.msk [vmem:[#allocation10] sm:$0x3] %vm410_vm8, %v408_v3 }
 0x4df   :  { %620 = vmatmul.msk.f32.vlgmr.msrb.gmra.mxu0 %vm423_vm9, %v417_v4  ;;  %621 = vmatmul.msk.f32.vlgmr.msrb.gmra.mxu1 %vm423_vm9, %v417_v4 }
 0x55c   :  { %v444_v8 = vpop.f32.mrf.mxu0  ;;  %v464_v9 = vpop.f32.mrf.mxu1 }
 0x55d   :  { %v445_v10 = vadd.f32 %v444_v8, %v419_v6  ;;  %v465_v11 = vadd.f32 %v464_v9, %v420_v7 }
 0x55f   :  { %515 = vrot.lane.b32.xlu0 %v465_v11, %s788_s3  ;;  %468 = vrot.lane.b32.xlu1 %v445_v10, %s789_s27 }
 0x567   :  { %492 = vrot.lane.b32.xlu1 %v465_v11, %s789_s27 }
 0x5d1   :  { %v469_v12 = vpop.permute.xlu1 %468  ;;  %v516_v26 = vpop.permute.xlu0 %515 }
 0x5d2   :  { %v471_v13 = vadd.f32 %v469_v12, %v445_v10 }
 0x5d4   :  { %v622_v14 = vmul.f32 -1.442695, %v471_v13 }
 0x5d6   :  { %655 = vpow2.f32 %v622_v14 }
 0x5d9   :  { %v493_v32 = vpop.permute.xlu1 %492 }
 0x5da   :  { %v495_v33 = vadd.f32 %v493_v32, %v445_v10 }
 0x5dc   :  { %v656_v15 = vpop.eup %655  ;;  %v623_v34 = vmul.f32 -1.442695, %v495_v33 }
 0x5dd   :  { %v475_v16 = vadd.f32 1.0, %v656_v15 }
 0x5df   :  { %657 = vrcp.f32 %v475_v16  ;;  %v487_v20 = vand.u32 2147483648, %v475_v16  ;;  %v485_v22 = vand.u32 2147483647, %v475_v16  ;;  %vm481_vm11 = vweird.f32 %v475_v16 }
 0x5e1   :  { %v488_v24 = vor.u32 1.1754944e-38, %v487_v20  ;;  %vm486_vm13 = vcmp.eq.f32.partialorder %v485_v22, 8.507059e+37 }
 0x5e5   :  { %v658_v17 = vpop.eup %657 }
 0x5e6   :  { %v477_v18 = vmul.f32 %v658_v17, %v475_v16  ;;  %vm482_vm10 = vweird.f32 %v658_v17 }
 0x5e7   :  { %vm483_vm12 = vmor %vm481_vm11, %vm482_vm10 }
 0x5e8   :  { %v478_v19 = vsub.f32 1.0, %v477_v18 }
 0x5ea   :  { %v479_v21 = vmul.f32 %v658_v17, %v478_v19 }
 0x5ec   :  { %v480_v23 = vadd.f32 %v658_v17, %v479_v21 }
 0x5ee   :  { %v484_v25 = vsel %vm483_vm12, %v658_v17, %v480_v23 }
 0x5ef   :  { %v489_v27 = vsel %vm486_vm13, %v488_v24, %v484_v25 }
 0x5f0   :  { %v518_v28 = vmul.f32 %v516_v26, %v489_v27 }
 0x5f2   :  { %520 = vrot.lane.b32.xlu2 %v518_v28, %s790_s5 }
 0x64c   :  { %v521_v29 = vpop.permute.xlu2 %520 }
 0x64d   :  { %v523_v30 = vadd.f32 %v521_v29, %v445_v10 }
 0x64f   :  { %659 = vtanh.f32 %v523_v30 }
 0x650   :  { %661 = vpow2.f32 %v623_v34 }
 0x655   :  { %v660_v31 = vpop.eup %659 }
 0x656   :  { %527 = vrot.lane.b32.xlu0 %v660_v31, %s788_s3  ;;  %v662_v35 = vpop.eup %661 }
 0x657   :  { %v499_v36 = vadd.f32 1.0, %v662_v35 }
 0x659   :  { %663 = vrcp.f32 %v499_v36  ;;  %v511_v46 = vand.u32 2147483648, %v499_v36  ;;  %vm505_vm15 = vweird.f32 %v499_v36  ;;  %v509_v47 = vand.u32 2147483647, %v499_v36 }
 0x65b   :  { %v512_v49 = vor.u32 1.1754944e-38, %v511_v46  ;;  %vm510_vm2 = vcmp.eq.f32.partialorder %v509_v47, 8.507059e+37 }
 0x65f   :  { %v664_v39 = vpop.eup %663 }
 0x660   :  { %v501_v41 = vmul.f32 %v664_v39, %v499_v36  ;;  %vm506_vm14 = vweird.f32 %v664_v39 }
 0x661   :  { %vm507_vm1 = vmor %vm505_vm15, %vm506_vm14 }
 0x662   :  { %v502_v43 = vsub.f32 1.0, %v501_v41 }
 0x664   :  { %v503_v44 = vmul.f32 %v664_v39, %v502_v43 }
 0x666   :  { %v504_v45 = vadd.f32 %v664_v39, %v503_v44 }
 0x668   :  { %v508_v48 = vsel %vm507_vm1, %v664_v39, %v504_v45 }
 0x669   :  { %v513_v50 = vsel %vm510_vm2, %v512_v49, %v508_v48 }
 0x66a   :  { %v525_v51 = vsub.f32 1.0, %v513_v50  ;;  %v531_v54 = vmul.f32 %v513_v50, %v915_v2 }
 0x6c8   :  { %v528_v52 = vpop.permute.xlu0 %527 }
 0x6c9   :  { %v530_v53 = vmul.f32 %v528_v52, %v525_v51 }
 0x6cb   :  { %v532_v55 = vadd.f32 %v531_v54, %v530_v53 }
 0x6cd   :  { %534 = vrot.lane.b32.xlu2 %v532_v55, %s788_s3 }
 0x727   :  { %v535_v56 = vpop.permute.xlu2 %534 }
 0x728   :  { %538 = vst.msk [vmem:[#allocation10 + $0x2] sm:$0x3] %vm410_vm8, %v535_v56  ;;  %624 = vmatmul.msk.f32.vlgmr.msra.gmra.mxu2 %vm99_vm0, %v535_v56 }
 0x729   :  { %593 = dma.vmem_to_hbm [thread:$0]  %s586_s15, 64, %s588_s18, [#allocation11], %s789_s27, %s789_s27, %s792_s1  }
 0x7ab   :  { %v566_v58 = vpop.f32.mrf.mxu2 }
 0x7ac   :  { %v567_v59 = vadd.f32 %v636_v57, %v566_v58 }
 0x7ae   :  { %569 = vst [vmem:[#allocation9] sm:$0x3] %v567_v59 }
 0x7af   :  { %580 = dma.vmem_to_hbm [thread:$0]  %s576_s21, 32, %s578_s24, [#allocation4]  }
 0x7b0   :  { %779 = dma.done.wait [#allocation4], 32  }
 0x7b1   :  { %780 = vsyncadd [#allocation4], 4294967264 }
 0x7b2   :  { %781 = dma.done.wait [#allocation11], 64  }
 0x7b3   :  { %782 = vsyncadd [#allocation11], 4294967232 }
 0x7b4   :  { %602 = vsyncpa [#allocation3], 1 }
 0x7b5   :  { %603 = vsyncpa [#allocation8], 1 }
 0x7b6   :  { %604 = vsyncpa [#allocation4], 1 }
 0x7b7   :  { %605 = vsyncpa [#allocation11], 1 }
 0x7b8   :  { %606 = vsyncpa [#allocation5], 1 }

</bundles_post_ra>
